<compile_context>
chip_gen: v7x
topology: tpu7x:2x2x1
jax: 0.10.0
libtpu: 0.0.40
codegen_flags: <defaults>
</compile_context>

<pallas_src>
import functools

import numpy as np
import jax
import jax.numpy as jnp
from jax import lax
from jax.experimental import pallas as pl
from jax.experimental.pallas import tpu as pltpu


# --------------------------------------------------------------------------- #
# Kernel
# --------------------------------------------------------------------------- #
def _moving_avg_matmul_kernel(w_ref, x_ref, o_ref):
    # w_ref: (L_out, L)   f32 pooling matrix (replicate pad, stride, 1/k baked in)
    # x_ref: (L, lanes)   input tile (time on sublanes, lane-dense channels)
    # o_ref: (L_out, lanes)
    x = x_ref[...].astype(jnp.float32)
    o_ref[...] = jnp.dot(
        w_ref[...], x,
        preferred_element_type=jnp.float32,
        precision=lax.Precision.HIGHEST,
    ).astype(o_ref.dtype)


# --------------------------------------------------------------------------- #
# Host-side helpers
# --------------------------------------------------------------------------- #
def _pool_matrix(seq_len, kernel_size, stride, pad, out_len):
    """W[t, j] = (# taps of window t landing on source row j) / k, with the
    replicate padding folded in via index clamping."""
    pos = np.arange(out_len)[:, None] * stride + np.arange(kernel_size)[None, :]
    src = np.clip(pos - pad, 0, seq_len - 1)                     # (out_len, k)
    w = np.zeros((out_len, seq_len), np.float32)
    np.add.at(
        w,
        (np.repeat(np.arange(out_len), kernel_size), src.ravel()),
        np.float32(1.0 / kernel_size),
    )
    return jnp.asarray(w)


def _pick_lane_tile(n, want_multi):
    """Largest 128-multiple tile dividing n; prefer >= 2 grid steps if asked."""
    cands = [t for t in (1024, 512, 256, 128) if n % t == 0]
    if not cands:
        return n
    if want_multi:
        for t in cands:
            if n // t >= 2:
                return t
    return cands[0]


def _vmem_limit(in_b, out_b, w_b):
    # in/out blocks are 2-deep buffered by the pipeline; W is resident once
    # (constant index map) but budget 2x to be safe; + compiler headroom.
    need = 2 * (in_b + out_b + w_b) + (4 << 20)
    return int(min(48 << 20, max(16 << 20, need)))


# --------------------------------------------------------------------------- #
# Public wrapper
# --------------------------------------------------------------------------- #
def moving_avg(x, kernel_size, stride):
    """x: [B, L, C] -> [B, L_out, C]; matches the PyTorch moving_avg module."""
    B, L, C = x.shape
    pad = (kernel_size - 1) // 2
    L_pad = L + 2 * pad
    out_len = (L_pad - kernel_size) // stride + 1
    w = _pool_matrix(L, kernel_size, stride, pad, out_len)
    itemsize = x.dtype.itemsize
    w_bytes = out_len * L * 4
    kernel = _moving_avg_matmul_kernel

    if C >= 128:
        # ---- Direct [B, L, C] path: no wrapper transposes. -----------------
        if C % 128 == 0:
            c_t = _pick_lane_tile(C, want_multi=(B == 1))
        else:
            c_t = C          # full-dim last block dim is legal even if not %128
        grid = (B, C // c_t)
        limit = _vmem_limit(L * c_t * itemsize, out_len * c_t * itemsize, w_bytes)
        return pl.pallas_call(
            kernel,
            out_shape=jax.ShapeDtypeStruct((B, out_len, C), x.dtype),
            grid_spec=pltpu.PrefetchScalarGridSpec(
                num_scalar_prefetch=0,
                grid=grid,
                in_specs=[
                    pl.BlockSpec((out_len, L), lambda b, c: (0, 0)),
                    pl.BlockSpec((None, L, c_t), lambda b, c: (b, 0, c)),
                ],
                out_specs=pl.BlockSpec((None, out_len, c_t),
                                       lambda b, c: (b, 0, c)),
            ),
            compiler_params=pltpu.CompilerParams(
                dimension_semantics=("parallel", "parallel"),
                vmem_limit_bytes=limit),
        )(w, x)

    # ---- Tiny C: fold batch into the lane axis, pad to a 128 multiple. -----
    n = B * C
    n_pad = ((n + 127) // 128) * 128
    x2d = jnp.transpose(x, (1, 0, 2)).reshape(L, n)
    if n_pad != n:
        x2d = jnp.pad(x2d, ((0, 0), (0, n_pad - n)))
    n_t = _pick_lane_tile(n_pad, want_multi=True)
    limit = _vmem_limit(L * n_t * itemsize, out_len * n_t * itemsize, w_bytes)
    out2d = pl.pallas_call(
        kernel,
        out_shape=jax.ShapeDtypeStruct((out_len, n_pad), x.dtype),
        grid_spec=pltpu.PrefetchScalarGridSpec(
            num_scalar_prefetch=0,
            grid=(n_pad // n_t,),
            in_specs=[
                pl.BlockSpec((out_len, L), lambda j: (0, 0)),
                pl.BlockSpec((L, n_t), lambda j: (0, j)),
            ],
            out_specs=pl.BlockSpec((out_len, n_t), lambda j: (0, j)),
        ),
        compiler_params=pltpu.CompilerParams(
            dimension_semantics=("parallel",),
            vmem_limit_bytes=limit),
    )(w, x2d)
    out2d = out2d[:, :n]
    return jnp.transpose(out2d.reshape(out_len, B, C), (1, 0, 2))


# --------------------------------------------------------------------------- #
# Self-test
# --------------------------------------------------------------------------- #
if __name__ == "__main__":
    def reference(x, k, s):
        pad = (k - 1) // 2
        front = jnp.repeat(x[:, :1, :], pad, axis=1)
        end = jnp.repeat(x[:, -1:, :], pad, axis=1)
        xp = jnp.concatenate([front, x, end], axis=1)
        out_len = (xp.shape[1] - k) // s + 1
        return jnp.stack(
            [xp[:, t * s:t * s + k, :].mean(axis=1) for t in range(out_len)],
            axis=1)

    key = jax.random.PRNGKey(0)
    cases = [
        # (B, L, C, kernel_size, stride)
        (2, 16, 8, 5, 1),     # tiny C -> lane-folded + padded path
        (2, 32, 8, 25, 1),    # Autoformer-sized kernel
        (2, 16, 8, 6, 2),     # even kernel + stride > 1
        (2, 16, 8, 9, 2),     # larger kernel + stride > 1
        (2, 16, 256, 7, 1),   # C % 128 == 0 -> direct [B, L, C] path, tiled C
        (2, 16, 160, 25, 1),  # C >= 128 but not a 128 multiple -> full-C block
    ]
    for idx, (B, L, C, k, s) in enumerate(cases):
        key, sub = jax.random.split(key)
        x = jax.random.normal(sub, (B, L, C), dtype=jnp.float32)
        out = jax.block_until_ready(moving_avg(x, k, s))
        ref = reference(x, k, s)
        assert out.shape == ref.shape, (idx, out.shape, ref.shape)
        err = float(jnp.max(jnp.abs(out - ref)))
        assert jnp.allclose(out, ref, atol=1e-5, rtol=1e-5), (idx, err)

    print("KERNEL_OK")
</pallas_src>

<mosaic_0001>
module attributes {stable_mosaic.version = 11 : i64} {
  func.func @_moving_avg_matmul_kernel(%arg0: i32, %arg1: memref<16x16xf32, #tpu.memory_space<vmem>>, %arg2: memref<16x128xf32, #tpu.memory_space<vmem>>, %arg3: memref<16x128xf32, #tpu.memory_space<vmem>>) attributes {dimension_semantics = [#tpu.dimension_semantics<parallel>], iteration_bounds = array<i64: 1>, scalar_prefetch = 0 : i64, scratch_operands = 0 : i64, tpu.core_type = #tpu.core_type<tc>, window_params = [{pipeline_mode = #tpu.pipeline_mode<synchronous>, transform_indices = @transform_0, window_bounds = array<i64: 16, 16>}, {transform_indices = @transform_1, window_bounds = array<i64: 16, 128>}, {transform_indices = @transform_2, window_bounds = array<i64: 16, 128>}]} {
    %c0 = arith.constant 0 : index
    %c0_0 = arith.constant 0 : index
    %0 = vector.load %arg2[%c0, %c0_0] : memref<16x128xf32, #tpu.memory_space<vmem>>, vector<16x128xf32>
    %c0_1 = arith.constant 0 : index
    %c0_2 = arith.constant 0 : index
    %1 = vector.load %arg1[%c0_1, %c0_2] : memref<16x16xf32, #tpu.memory_space<vmem>>, vector<16x16xf32>
    %cst = arith.constant dense<0.000000e+00> : vector<16x128xf32>
    %2 = tpu.matmul %1, %0, %cst {dimension_numbers = #tpu.dot_dimension_numbers<[1], [0], [0], [1], [0, 0, 1, 1], [], []>, precision = #tpu.contract_precision<fp32>} : vector<16x16xf32>, vector<16x128xf32>, vector<16x128xf32> -> vector<16x128xf32>
    %c0_3 = arith.constant 0 : index
    %c0_4 = arith.constant 0 : index
    %3 = vector.load %arg3[%c0_3, %c0_4] : memref<16x128xf32, #tpu.memory_space<vmem>>, vector<16x128xf32>
    tpu.vector_store %arg3[%c0_3, %c0_4], %2 {strides = array<i32>} : memref<16x128xf32, #tpu.memory_space<vmem>>, vector<16x128xf32>,
    return
  }
  func.func @transform_0(%arg0: i32) -> (i32, i32) {
    %c0_i32 = arith.constant 0 : i32
    %c0_i32_0 = arith.constant 0 : i32
    %c0_i32_1 = arith.constant 0 : i32
    return %c0_i32, %c0_i32_0 : i32, i32
  }
  func.func @transform_1(%arg0: i32) -> (i32, i32) {
    %c0_i32 = arith.constant 0 : i32
    %c0_i32_0 = arith.constant 0 : i32
    return %c0_i32, %arg0 : i32, i32
  }
  func.func @transform_2(%arg0: i32) -> (i32, i32) {
    %c0_i32 = arith.constant 0 : i32
    %c0_i32_0 = arith.constant 0 : i32
    return %c0_i32, %arg0 : i32, i32
  }
}

</mosaic_0001>

<bundles_post_ra>
// kernel: tpu_custom_call.1
= control target key start
LH: loop header
LB: loop body
LE: loop exit
PB: predicated region body
PF: predicated region fallthrough
CT: control target
= control target key end

     0   :  { %7 = vsyncpa [#allocation3], 0  ;;  %s815_s0 = inlined_call_operand.hbm [shape: f32[16,16], index: 0, kind: input, shape index: {}]   ;;  %s816_s1 = inlined_call_operand.hbm [shape: f32[16,128], index: 1, kind: input, shape index: {}]   ;;  %s817_s2 = inlined_call_operand.hbm [shape: f32[16,128], index: 2, kind: output, shape index: {}]  }
   0x1   :  { %8 = vsyncpa [#allocation6], 0 }
   0x2   :  { %9 = vsyncpa [#allocation4], 0  ;;  %s750_s9 = smov [#allocation2]   ;;  %s678_s13 = scalar_lea.hbm %s815_s0, 256 }
   0x3   :  { %s15_s10 = sshll.u32 %s750_s9, 4  ;;  %p679_p0 = scmp.ne.s32.totalorder %s815_s0, %s678_s13  ;;  %s16_s10 = int_to_ptr.vmem [resolvable:$true] %s15_s10 }
   0x4   :  { %p682_p1 = scmp.lt.u32.totalorder %s678_s13, %s815_s0 }
   0x6   :  { %p684_p2 = pnand %p682_p1, %p679_p0 }
   0x8   :  { %687 = shalt.err (!%p684_p2)
}
   0x9   :  { %s688_s18 = scalar_lea.vmem %s16_s10, 256  ;;  %p693_p4 = scmp.lt.s32.totalorder %s16_s10, %s16_s10 }
   0xa   :  { %p689_p3 = scmp.ne.s32.totalorder %s16_s10, %s688_s18  ;;  %p694_p5 = scmp.lt.s32.totalorder %s688_s18, %s688_s18 }
   0xc   :  { %p695_p6 = por %p694_p5, %p693_p4 }
   0xe   :  { %p696_p7 = pnand %p695_p6, %p689_p3 }
  0x10   :  { %699 = shalt.err (!%p696_p7)
}
  0x11   :  { %s751_s19 = smov 128   ;;  %s752_s20 = smov 8  }
  0x12   :  { %21 = dma.hbm_to_vmem [thread:$0]  %s815_s0, 256, %s16_s10, [#allocation3], %s751_s19, %s751_s19, %s752_s20  }
  0x13   :  { %s753_s23 = smov [#allocation5]   ;;  %s700_s27 = scalar_lea.hbm %s816_s1, 256 }
  0x14   :  { %s27_s24 = sshll.u32 %s753_s23, 4  ;;  %p701_p8 = scmp.ne.s32.totalorder %s816_s1, %s700_s27  ;;  %s28_s24 = int_to_ptr.vmem [resolvable:$true] %s27_s24 }
  0x15   :  { %p704_p9 = scmp.lt.u32.totalorder %s700_s27, %s816_s1 }
  0x17   :  { %p706_p10 = pnand %p704_p9, %p701_p8 }
  0x19   :  { %709 = shalt.err (!%p706_p10)
}
  0x1a   :  { %s710_s4 = scalar_lea.vmem %s28_s24, 256  ;;  %p715_p12 = scmp.lt.s32.totalorder %s28_s24, %s28_s24 }
  0x1b   :  { %p711_p11 = scmp.ne.s32.totalorder %s28_s24, %s710_s4  ;;  %p716_p13 = scmp.lt.s32.totalorder %s710_s4, %s710_s4 }
  0x1d   :  { %p717_p0 = por %p716_p13, %p715_p12 }
  0x1f   :  { %p718_p1 = pnand %p717_p0, %p711_p11 }
  0x21   :  { %721 = shalt.err (!%p718_p1)
}
  0x22   :  { %33 = dma.hbm_to_vmem [thread:$0]  %s816_s1, 256, %s28_s24, [#allocation6], %s751_s19, %s751_s19, %s752_s20  }
  0x23   :  { %744 = dma.done.wait [#allocation3], 256  }
  0x24   :  { %745 = vsyncadd [#allocation3], 4294967040 }
  0x25   :  { %746 = dma.done.wait [#allocation6], 256  }
  0x26   :  { %747 = vsyncadd [#allocation6], 4294967040  ;;  %vm44_vm0 = vcmask 130048   ;;  %v40_v0 = vld [vmem:[#allocation5] sm:$0xff]  ;;  %v41_v1 = vld [vmem:[#allocation5 + $0x8] sm:$0xff]  ;;  %s754_s1 = smov [#allocation7]  }
  0x27   :  { %v42_v2 = vld [vmem:[#allocation2] sm:$0xff]  ;;  %v52_v3 = vand.u32 4294901760, %v40_v0  ;;  %v55_v4 = vand.u32 4294901760, %v41_v1  ;;  %v43_v5 = vld [vmem:[#allocation2 + $0x8] sm:$0xff]  ;;  %s560_s6 = sshll.u32 %s754_s1, 4  ;;  %s561_s6 = int_to_ptr.vmem [resolvable:$true] %s560_s6 }
  0x28   :  { %v46_v6 = vsel %vm44_vm0, %v42_v2, 0  ;;  %v49_v7 = vsel %vm44_vm0, %v43_v5, 0  ;;  %s722_s7 = scalar_lea.vmem %s561_s6, 256  ;;  %p727_p3 = scmp.lt.s32.totalorder %s561_s6, %s561_s6 }
  0x29   :  { %v118_v8 = vand.u32 4294901760, %v46_v6  ;;  %v639_v9 = vpack.c.bf16 %v55_v4, %v52_v3  ;;  %v128_v10 = vand.u32 4294901760, %v49_v7  ;;  %v140_v11 = vsub.f32 %v40_v0, %v52_v3  ;;  %p723_p2 = scmp.ne.s32.totalorder %s561_s6, %s722_s7  ;;  %p728_p4 = scmp.lt.s32.totalorder %s722_s7, %s722_s7 }
  0x2a   :  { %v147_v12 = vsub.f32 %v41_v1, %v55_v4 }
  0x2b   :  { %v119_v13 = vsub.f32 %v46_v6, %v118_v8  ;;  %652 = vmatprep.subr.bf16.mxu0 %v639_v9  ;;  %640 = vmatprep.subr.bf16.mxu1 %v639_v9  ;;  %v129_v14 = vsub.f32 %v49_v7, %v128_v10  ;;  %v141_v15 = vand.u32 4294901760, %v140_v11  ;;  %p729_p5 = por %p728_p4, %p727_p3 }
  0x2c   :  { %v148_v16 = vand.u32 4294901760, %v147_v12  ;;  %654 = vmatpush3.bf16.msra.mxu0 %v639_v9  ;;  %642 = vmatpush3.bf16.msra.mxu1 %v639_v9  ;;  %v647_v29 = vpack.c.bf16 %v147_v12, %v140_v11 }
  0x2d   :  { %v120_v17 = vand.u32 4294901760, %v119_v13  ;;  %v130_v18 = vand.u32 4294901760, %v129_v14  ;;  %v142_v19 = vsub.f32 %v140_v11, %v141_v15  ;;  %p730_p6 = pnand %p729_p5, %p723_p2 }
  0x2e   :  { %v149_v20 = vsub.f32 %v147_v12, %v148_v16  ;;  %v655_v21 = vpack.c.bf16 %v148_v16, %v141_v15 }
  0x2f   :  { %622 = vmatprep.mubr.f32.mxu0 %v120_v17  ;;  %v121_v22 = vsub.f32 %v119_v13, %v120_v17  ;;  %v131_v23 = vsub.f32 %v129_v14, %v130_v18  ;;  %v143_v24 = vand.u32 4294901760, %v142_v19 }
  0x30   :  { %623 = vmatmul.mubr.f32.vlgmr.msra.gmra.mrb[0].mxu0 %v130_v18  ;;  %v150_v25 = vand.u32 4294901760, %v149_v20  ;;  %656 = vmatprep.subr.bf16.mxu0 %v655_v21 }
  0x31   :  { %v122_v26 = vand.u32 4294901760, %v121_v22  ;;  %658 = vmatpush3.bf16.msra.mxu0 %v655_v21  ;;  %629 = vmatprep.mubr.f32.mxu0 %v118_v8  ;;  %v132_v27 = vand.u32 4294901760, %v131_v23 }
  0x32   :  { %v643_v28 = vpack.c.bf16 %v150_v25, %v143_v24  ;;  %660 = vmatprep.subr.bf16.mxu0 %v639_v9 }
  0x33   :  { %601 = vmatprep.mubr.f32.mxu1 %v122_v26 }
  0x34   :  { %602 = vmatmul.mubr.f32.vlgmr.msra.gmra.mrb[0].mxu1 %v132_v27  ;;  %644 = vmatprep.subr.bf16.mxu1 %v643_v28 }
  0x35   :  { %646 = vmatpush3.bf16.msra.mxu1 %v643_v28  ;;  %608 = vmatprep.mubr.f32.mxu1 %v118_v8 }
  0x36   :  { %648 = vmatprep.subr.bf16.mxu1 %v647_v29 }
  0x38   :  { %630 = vmatmul.mubr.f32.vlgmr.msra.gmra.mrb[0].mxu0 %v128_v10 }
  0x39   :  { %662 = vmatpush3.bf16.msra.mxu0 %v639_v9  ;;  %636 = vmatprep.mubr.f32.mxu0 %v118_v8 }
  0x3c   :  { %609 = vmatmul.mubr.f32.vlgmr.msra.gmra.mrb[0].mxu1 %v128_v10 }
  0x3d   :  { %650 = vmatpush3.bf16.msra.mxu1 %v647_v29  ;;  %615 = vmatprep.mubr.f32.mxu1 %v119_v13 }
  0x40   :  { %637 = vmatmul.mubr.f32.vlgmr.msra.gmra.mrb[0].mxu0 %v128_v10 }
  0x44   :  { %616 = vmatmul.mubr.f32.vlgmr.msra.gmra.mrb[0].mxu1 %v129_v14 }
 0x113   :  { %v638_v30 = vpop.f32.mrb[0].mxu0 }
 0x114   :  { %v543_v31 = vpop.f32.mrb[1].mxu0 }
 0x117   :  { %v617_v32 = vpop.f32.mrb[0].mxu1 }
 0x118   :  { %v663_v33 = vadd.f32 %v638_v30, %v617_v32  ;;  %v297_v34 = vpop.f32.mrb[1].mxu1 }
 0x119   :  { %v664_v35 = vadd.f32 %v543_v31, %v297_v34 }
 0x11a   :  { %554 = vst [vmem:[#allocation7 + $0x8] sm:$0xff] %v663_v33 }
 0x11b   :  { %553 = vst [vmem:[#allocation7] sm:$0xff] %v664_v35 }
 0x11c   :  { %733 = shalt.err (!%p730_p6)
}
 0x11d   :  { %s734_s10 = scalar_lea.hbm %s817_s2, 256 }
 0x11e   :  { %p735_p7 = scmp.ne.s32.totalorder %s817_s2, %s734_s10  ;;  %p738_p8 = scmp.lt.u32.totalorder %s734_s10, %s817_s2 }
 0x120   :  { %p740_p9 = pnand %p738_p8, %p735_p7 }
 0x122   :  { %743 = shalt.err (!%p740_p9)
}
 0x123   :  { %566 = dma.vmem_to_hbm [thread:$0]  %s561_s6, 256, %s817_s2, [#allocation4], %s751_s19, %s751_s19, %s752_s20  }
 0x124   :  { %748 = dma.done.wait [#allocation4], 256  }
 0x125   :  { %749 = vsyncadd [#allocation4], 4294967040 }
 0x126   :  { %570 = vsyncpa [#allocation3], 1 }
 0x127   :  { %571 = vsyncpa [#allocation6], 1 }
 0x128   :  { %572 = vsyncpa [#allocation4], 1 }

</bundles_post_ra>
